<compile_context>
chip_gen: v6e
topology: v6e:2x2x1
jax: 0.10.0
libtpu: 0.0.40
codegen_flags: <defaults>
</compile_context>

<pallas_src>
import jax
import jax.numpy as jnp
from jax.experimental import pallas as pl
from jax.experimental.pallas import tpu as pltpu


# --------------------------------------------------------------------------- kernel

def _make_prompt_kernel(n_ctx: int):
    """Kernel assembling [prefix | ctx | suffix] for a block of classes."""

    def kernel(prefix_ref, ctx_ref, suffix_ref, out_ref):
        # prefix_ref: (C_BLK, D)        [SOS] row per class (sublane-dense 2D block)
        # ctx_ref:    (n_ctx, D)        shared learnable context, broadcast over classes
        # suffix_ref: (C_BLK, S, D)     class-name + EOS + pad rows
        # out_ref:    (C_BLK, 1 + n_ctx + S, D)
        c_blk, d = prefix_ref.shape
        odt = out_ref.dtype
        # Three direct sub-slice stores (static ref views, no concat temporary).
        out_ref[:, 0, :] = prefix_ref[...].astype(odt)
        ctx_b = jnp.broadcast_to(ctx_ref[...][None, :, :], (c_blk, n_ctx, d))
        out_ref[:, 1:1 + n_ctx, :] = ctx_b.astype(odt)
        out_ref[:, 1 + n_ctx:, :] = suffix_ref[...].astype(odt)

    return kernel


# ------------------------------------------------------------------ sizing helpers

def _tpu_chip_profile():
    """Best-effort chip probe: (vmem_capacity_bytes, multi_tensorcore)."""
    vmem_bytes = 128 << 20
    try:
        vmem_bytes = int(pltpu.get_tpu_info().vmem_capacity_bytes)
    except Exception:
        pass
    kind = ""
    try:
        kind = jax.devices()[0].device_kind.lower()
    except Exception:
        pass
    # v7x: 64 MiB VMEM per TC, 2 TensorCores per chip.  v5e/v6e: 128 MiB, 1 TC.
    multi_tc = ("v7" in kind) or (vmem_bytes <= (64 << 20))
    return vmem_bytes, multi_tc


def _budgets(vmem_bytes, multi_tc):
    """(tile_budget_bytes, vmem_limit_cap_bytes) per chip generation."""
    if multi_tc:                              # v7x
        tile_budget = min(16 << 20, vmem_bytes // 4)
        vmem_cap = min(32 << 20, vmem_bytes // 2)
    else:                                     # v5e / v6e
        tile_budget = min(48 << 20, vmem_bytes * 3 // 8)
        vmem_cap = min(64 << 20, vmem_bytes // 2)
    return tile_budget, vmem_cap


def _largest_divisor_at_most(n, cap):
    for d in range(min(cap, n), 0, -1):
        if n % d == 0:
            return d
    return 1


def _choose_class_block(n_cls, per_class_bytes, tile_budget_bytes, multi_tc):
    """How many classes to assemble per grid step (budget counts double-buffering)."""
    c_blk = max(1, tile_budget_bytes // (2 * per_class_bytes))
    c_blk = min(c_blk, n_cls)
    # Only force >= 2 grid steps on multi-TC chips (v7x) where the parallel class
    # axis can be sharded across TensorCores, and only when n_cls is big enough
    # for the split to be worth the extra per-step overhead.
    if multi_tc and n_cls >= 8:
        c_blk = min(c_blk, pl.cdiv(n_cls, 2))
    # Snap to a divisor of n_cls so the last step isn't a ragged padded block,
    # unless that would shrink the block by more than ~2x.
    if 0 < c_blk < n_cls:
        d = _largest_divisor_at_most(n_cls, c_blk)
        if d >= max(1, c_blk // 2):
            c_blk = d
    return int(max(1, c_blk))


# ------------------------------------------------------------------------- wrapper

def prompt_learner_forward(ctx, token_prefix, token_suffix, *,
                           out_dtype=None,
                           class_block=None,
                           tile_budget_bytes=None):
    """Pallas implementation of PromptLearner.forward (class_token_position='end').

    ctx:          (n_ctx, ctx_dim)                 generic learnable context vectors
    token_prefix: (n_cls, 1, ctx_dim) or (n_cls, ctx_dim)   frozen [SOS] embeddings
    token_suffix: (n_cls, suf_len, ctx_dim)
    out_dtype:    optional output dtype (e.g. bf16 when the encoder runs bf16)
    returns:      (n_cls, 1 + n_ctx + suf_len, ctx_dim)
    """
    n_ctx, ctx_dim = ctx.shape
    if token_prefix.ndim == 3:
        assert token_prefix.shape[1] == 1 and token_prefix.shape[2] == ctx_dim
        token_prefix = token_prefix.reshape(token_prefix.shape[0], ctx_dim)
    n_cls = token_prefix.shape[0]
    assert token_suffix.shape[0] == n_cls and token_suffix.shape[2] == ctx_dim
    suf_len = token_suffix.shape[1]
    seq_len = 1 + n_ctx + suf_len

    in_dtype = ctx.dtype
    out_dtype = in_dtype if out_dtype is None else jnp.dtype(out_dtype)
    in_item = jnp.dtype(in_dtype).itemsize
    out_item = jnp.dtype(out_dtype).itemsize

    vmem_bytes, multi_tc = _tpu_chip_profile()
    auto_budget, vmem_cap = _budgets(vmem_bytes, multi_tc)
    if tile_budget_bytes is None:
        tile_budget_bytes = auto_budget

    # Bytes held per class: prefix row + suffix rows (inputs) + full output row block.
    per_class_bytes = (1 + suf_len) * ctx_dim * in_item + seq_len * ctx_dim * out_item

    if class_block is None:
        c_blk = _choose_class_block(n_cls, per_class_bytes, tile_budget_bytes, multi_tc)
    else:
        c_blk = int(class_block)
    c_blk = max(1, min(c_blk, n_cls))

    grid = (pl.cdiv(n_cls, c_blk),)

    # Explicit VMEM limit: double-buffered class tiles + (tiny) ctx block, with
    # 25% headroom, capped per-generation (<= 32 MiB on v7x's 64 MiB VMEM).
    tile_bytes = 2 * (c_blk * per_class_bytes + n_ctx * ctx_dim * in_item)
    vmem_limit_bytes = int(min(vmem_cap, max(16 << 20, tile_bytes * 5 // 4)))

    kernel = _make_prompt_kernel(n_ctx)

    grid_spec = pltpu.PrefetchScalarGridSpec(
        num_scalar_prefetch=0,
        grid=grid,
        in_specs=[
            # prefix: sublane-dense (C_BLK, D) block per grid step
            pl.BlockSpec((c_blk, ctx_dim), lambda i: (i, 0)),
            # ctx: same (full) block every grid step (broadcast over classes)
            pl.BlockSpec((n_ctx, ctx_dim), lambda i: (0, 0)),
            # suffix: (C_BLK, suf_len, D) block per grid step
            pl.BlockSpec((c_blk, suf_len, ctx_dim), lambda i: (i, 0, 0)),
        ],
        out_specs=pl.BlockSpec((c_blk, seq_len, ctx_dim), lambda i: (i, 0, 0)),
    )

    return pl.pallas_call(
        kernel,
        out_shape=jax.ShapeDtypeStruct((n_cls, seq_len, ctx_dim), out_dtype),
        grid_spec=grid_spec,
        compiler_params=pltpu.CompilerParams(
            dimension_semantics=("parallel",),
            vmem_limit_bytes=vmem_limit_bytes),
    )(token_prefix, ctx, token_suffix)


# ---------------------------------------------------------------------------- main

if __name__ == "__main__":
    # Small, deterministic synthetic shapes consistent with the module:
    #   tokenizer max_length = 25 tokens, n_ctx context tokens, ctx_dim embed width.
    # (Module uses ctx_dim=768; 128 keeps the example small while lane-aligned.)
    n_cls = 3
    n_ctx = 4
    ctx_dim = 128
    seq_len = 25                       # tokenizer max_length in the module
    suf_len = seq_len - 1 - n_ctx      # everything after [SOS] + ctx tokens
    dtype = jnp.float32

    key = jax.random.PRNGKey(0)
    k_ctx, k_pre, k_suf = jax.random.split(key, 3)

    # ctx vectors ~ N(0, 0.02) as in nn.init.normal_(ctx_vectors, std=0.02)
    ctx = (0.02 * jax.random.normal(k_ctx, (n_ctx, ctx_dim))).astype(dtype)
    # TODO(synk): the real module loads ctx from a .pt checkpoint and builds
    # prefix/suffix via the MedCLIP tokenizer + frozen word-embedding table
    # (init-time only, not part of the forward pass); both are synthesized here.
    token_prefix = jax.random.normal(k_pre, (n_cls, 1, ctx_dim)).astype(dtype)
    token_suffix = jax.random.normal(k_suf, (n_cls, suf_len, ctx_dim)).astype(dtype)

    prompts = prompt_learner_forward(ctx, token_prefix, token_suffix)
    prompts = jax.block_until_ready(prompts)

    # Pure-JAX reference for the forward pass.
    ctx_b = jnp.broadcast_to(ctx[None, :, :], (n_cls, n_ctx, ctx_dim))
    ref = jnp.concatenate([token_prefix, ctx_b, token_suffix], axis=1)

    assert prompts.shape == (n_cls, seq_len, ctx_dim), prompts.shape
    assert prompts.dtype == dtype
    assert jnp.array_equal(prompts, ref), "mismatch vs reference"

    # bf16 output path (in-kernel cast on the store): halves output write bytes
    # when the downstream text encoder consumes bf16.
    prompts_bf16 = prompt_learner_forward(
        ctx, token_prefix, token_suffix, out_dtype=jnp.bfloat16)
    prompts_bf16 = jax.block_until_ready(prompts_bf16)
    assert prompts_bf16.dtype == jnp.bfloat16
    assert jnp.array_equal(prompts_bf16, ref.astype(jnp.bfloat16)), \
        "bf16-output mismatch vs reference"

    # All-bf16 path (bf16 inputs too — halves input read bytes as well).
    prompts_all_bf16 = prompt_learner_forward(
        ctx.astype(jnp.bfloat16),
        token_prefix.astype(jnp.bfloat16),
        token_suffix.astype(jnp.bfloat16))
    prompts_all_bf16 = jax.block_until_ready(prompts_all_bf16)
    ref_all_bf16 = jnp.concatenate(
        [token_prefix.astype(jnp.bfloat16),
         jnp.broadcast_to(ctx.astype(jnp.bfloat16)[None], (n_cls, n_ctx, ctx_dim)),
         token_suffix.astype(jnp.bfloat16)], axis=1)
    assert jnp.array_equal(prompts_all_bf16, ref_all_bf16), "bf16 mismatch vs reference"

    print("KERNEL_OK")
</pallas_src>

<mosaic_0001>
module attributes {stable_mosaic.version = 11 : i64} {
  func.func @kernel(%arg0: i32, %arg1: memref<3x128xf32, #tpu.memory_space<vmem>>, %arg2: memref<4x128xf32, #tpu.memory_space<vmem>>, %arg3: memref<3x20x128xf32, #tpu.memory_space<vmem>>, %arg4: memref<3x25x128xf32, #tpu.memory_space<vmem>>) attributes {dimension_semantics = [#tpu.dimension_semantics<parallel>], iteration_bounds = array<i64: 1>, scalar_prefetch = 0 : i64, scratch_operands = 0 : i64, tpu.core_type = #tpu.core_type<tc>, window_params = [{transform_indices = @transform_0, window_bounds = array<i64: 3, 128>}, {pipeline_mode = #tpu.pipeline_mode<synchronous>, transform_indices = @transform_1, window_bounds = array<i64: 4, 128>}, {transform_indices = @transform_2, window_bounds = array<i64: 3, 20, 128>}, {transform_indices = @transform_3, window_bounds = array<i64: 3, 25, 128>}]} {
    %c0 = arith.constant 0 : index
    %c0_0 = arith.constant 0 : index
    %0 = vector.load %arg1[%c0, %c0_0] : memref<3x128xf32, #tpu.memory_space<vmem>>, vector<3x128xf32>
    %c0_1 = arith.constant 0 : index
    %c0_2 = arith.constant 0 : index
    %c0_3 = arith.constant 0 : index
    %1 = vector.load %arg4[%c0_1, %c0_2, %c0_3] : memref<3x25x128xf32, #tpu.memory_space<vmem>>, vector<3x1x128xf32>
    %2 = vector.shape_cast %1 : vector<3x1x128xf32> to vector<3x128xf32>
    %3 = vector.shape_cast %0 : vector<3x128xf32> to vector<3x1x128xf32>
    tpu.vector_store %arg4[%c0_1, %c0_2, %c0_3], %3 {strides = array<i32>} : memref<3x25x128xf32, #tpu.memory_space<vmem>>, vector<3x1x128xf32>,
    %c0_4 = arith.constant 0 : index
    %c0_5 = arith.constant 0 : index
    %4 = vector.load %arg2[%c0_4, %c0_5] : memref<4x128xf32, #tpu.memory_space<vmem>>, vector<4x128xf32>
    %5 = vector.shape_cast %4 : vector<4x128xf32> to vector<1x4x128xf32>
    %6 = vector.shape_cast %5 : vector<1x4x128xf32> to vector<1x4x128xf32>
    %7 = vector.broadcast %6 : vector<1x4x128xf32> to vector<3x4x128xf32>
    %c0_6 = arith.constant 0 : index
    %c1 = arith.constant 1 : index
    %c0_7 = arith.constant 0 : index
    %8 = vector.load %arg4[%c0_6, %c1, %c0_7] : memref<3x25x128xf32, #tpu.memory_space<vmem>>, vector<3x4x128xf32>
    tpu.vector_store %arg4[%c0_6, %c1, %c0_7], %7 {strides = array<i32>} : memref<3x25x128xf32, #tpu.memory_space<vmem>>, vector<3x4x128xf32>,
    %c0_8 = arith.constant 0 : index
    %c0_9 = arith.constant 0 : index
    %c0_10 = arith.constant 0 : index
    %9 = vector.load %arg3[%c0_8, %c0_9, %c0_10] : memref<3x20x128xf32, #tpu.memory_space<vmem>>, vector<3x20x128xf32>
    %c0_11 = arith.constant 0 : index
    %c5 = arith.constant 5 : index
    %c0_12 = arith.constant 0 : index
    %10 = vector.load %arg4[%c0_11, %c5, %c0_12] : memref<3x25x128xf32, #tpu.memory_space<vmem>>, vector<3x20x128xf32>
    tpu.vector_store %arg4[%c0_11, %c5, %c0_12], %9 {strides = array<i32>} : memref<3x25x128xf32, #tpu.memory_space<vmem>>, vector<3x20x128xf32>,
    return
  }
  func.func @transform_0(%arg0: i32) -> (i32, i32) {
    %c0_i32 = arith.constant 0 : i32
    %c0_i32_0 = arith.constant 0 : i32
    return %arg0, %c0_i32 : i32, i32
  }
  func.func @transform_1(%arg0: i32) -> (i32, i32) {
    %c0_i32 = arith.constant 0 : i32
    %c0_i32_0 = arith.constant 0 : i32
    %c0_i32_1 = arith.constant 0 : i32
    return %c0_i32, %c0_i32_0 : i32, i32
  }
  func.func @transform_2(%arg0: i32) -> (i32, i32, i32) {
    %c0_i32 = arith.constant 0 : i32
    %c0_i32_0 = arith.constant 0 : i32
    %c0_i32_1 = arith.constant 0 : i32
    return %arg0, %c0_i32, %c0_i32_0 : i32, i32, i32
  }
  func.func @transform_3(%arg0: i32) -> (i32, i32, i32) {
    %c0_i32 = arith.constant 0 : i32
    %c0_i32_0 = arith.constant 0 : i32
    %c0_i32_1 = arith.constant 0 : i32
    return %arg0, %c0_i32, %c0_i32_0 : i32, i32, i32
  }
}

</mosaic_0001>

<bundles_post_ra>
// kernel: tpu_custom_call.1
= control target key start
LH: loop header
LB: loop body
LE: loop exit
PB: predicated region body
PF: predicated region fallthrough
CT: control target
= control target key end

     0   :  { %8 = vsyncpa [#allocation3], 0  ;;  %s264_s0 = inlined_call_operand.hbm [shape: f32[3,128], index: 0, kind: input, shape index: {}]   ;;  %s265_s1 = inlined_call_operand.hbm [shape: f32[4,128], index: 1, kind: input, shape index: {}]   ;;  %s266_s2 = inlined_call_operand.hbm [shape: f32[3,20,128], index: 2, kind: input, shape index: {}]   ;;  %s267_s3 = inlined_call_operand.hbm [shape: f32[3,25,128], index: 3, kind: output, shape index: {}]  }
   0x1   :  { %9 = vsyncpa [#allocation6], 0 }
   0x2   :  { %10 = vsyncpa [#allocation4], 0  ;;  %s219_s12 = smov [#allocation5]   ;;  %s220_s14 = smov [#allocation2]  }
   0x3   :  { %s27_s13 = sshll.u32 %s219_s12, 4  ;;  %s17_s15 = sshll.u32 %s220_s14, 4  ;;  %s28_s13 = int_to_ptr.vmem [resolvable:$true] %s27_s13  ;;  %s18_s15 = int_to_ptr.vmem [resolvable:$true] %s17_s15 }
   0x4   :  { %s141_s16 = scalar_lea.vmem %s28_s13, 64  ;;  %p146_p1 = scmp.lt.s32.totalorder %s28_s13, %s28_s13 }
   0x5   :  { %p142_p0 = scmp.ne.s32.totalorder %s28_s13, %s141_s16  ;;  %p147_p2 = scmp.lt.s32.totalorder %s141_s16, %s141_s16 }
   0x7   :  { %p148_p3 = por %p147_p2, %p146_p1 }
   0x9   :  { %p149_p4 = pnand %p148_p3, %p142_p0 }
   0xb   :  { %152 = shalt.err (!%p149_p4)
}
   0xc   :  { %30 = dma.hbm_to_vmem [thread:$0]  %s265_s1, 64, %s28_s13, [#allocation6]  }
   0xd   :  { %s161_s19 = scalar_lea.vmem %s18_s15, 64  ;;  %p166_p6 = scmp.lt.s32.totalorder %s18_s15, %s18_s15 }
   0xe   :  { %p162_p5 = scmp.ne.s32.totalorder %s18_s15, %s161_s19  ;;  %p167_p7 = scmp.lt.s32.totalorder %s161_s19, %s161_s19 }
  0x10   :  { %p168_p8 = por %p167_p7, %p166_p6 }
  0x12   :  { %p169_p9 = pnand %p168_p8, %p162_p5 }
  0x14   :  { %172 = shalt.err (!%p169_p9)
}
  0x15   :  { %20 = dma.hbm_to_vmem [thread:$0]  %s264_s0, 64, %s18_s15, [#allocation3]  }
  0x16   :  { %s221_s22 = smov [#allocation7]  }
  0x17   :  { %s36_s23 = sshll.u32 %s221_s22, 4  ;;  %s37_s23 = int_to_ptr.vmem [resolvable:$true] %s36_s23 }
  0x18   :  { %s181_s24 = scalar_lea.vmem %s37_s23, 1152  ;;  %p186_p11 = scmp.lt.s32.totalorder %s37_s23, %s37_s23 }
  0x19   :  { %p182_p10 = scmp.ne.s32.totalorder %s37_s23, %s181_s24  ;;  %p187_p12 = scmp.lt.s32.totalorder %s181_s24, %s181_s24 }
  0x1b   :  { %p188_p13 = por %p187_p12, %p186_p11 }
  0x1d   :  { %p189_p0 = pnand %p188_p13, %p182_p10 }
  0x1f   :  { %192 = shalt.err (!%p189_p0)
}
  0x20   :  { %s222_s1 = smov 128   ;;  %s223_s25 = smov 8  }
  0x21   :  { %42 = dma.hbm_to_vmem [thread:$0]  %s266_s2, 1152, %s37_s23, [#allocation6], %s222_s1, %s222_s1, %s223_s25  }
  0x22   :  { %213 = dma.done.wait [#allocation3], 64  }
  0x23   :  { %214 = vsyncadd [#allocation3], 4294967232 }
  0x24   :  { %215 = dma.done.wait [#allocation6], 1216  }
  0x25   :  { %216 = vsyncadd [#allocation6], 4294966080  ;;  %v65_v0 = vlaneseq  ;;  %v224_v1 = vmov 1966171168   ;;  %s225_s0 = smov [#allocation8]   ;;  %v87_v10 = vld [vmem:[#allocation7] sm:$0xff] }
  0x26   :  { %v63_v2 = vunpack.c.l.s4 %v224_v1  ;;  %s110_s28 = sshll.u32 %s225_s0, 4  ;;  %v123_v6 = vld.sshfl [vmem:[#allocation2] sm:$0x13 pattern:$0x75316420]  ;;  %v88_v11 = vld [vmem:[#allocation7 + $0x8] sm:$0xff]  ;;  %s111_s28 = int_to_ptr.vmem [resolvable:$true] %s110_s28 }
  0x27   :  { %v66_v3 = vshrl.u32 %v65_v0, 7  ;;  %v83_v7 = vld [vmem:[#allocation5] sm:$0xf]  ;;  %v61_v8 = vcombine.high %v123_v6, %v123_v6  ;;  %v89_v12 = vld [vmem:[#allocation7 + $0x10] sm:$0xf]  ;;  %96 = vst [vmem:[#allocation8 + $0x5] sm:$0xff] %v87_v10  ;;  %p198_p2 = scmp.lt.s32.totalorder %s111_s28, %s111_s28 }
  0x28   :  { %v64_v4 = vunpack.c.0.s8 %v63_v2  ;;  %124 = vst.sshfl [vmem:[#allocation8] sm:$0x1 pattern:$0x73625140] %v123_v6  ;;  %84 = vst [vmem:[#allocation8 + $0x1] sm:$0xf] %v83_v7 }
  0x29   :  { %85 = vst [vmem:[#allocation8 + $0x21] sm:$0xf] %v83_v7  ;;  %86 = vst [vmem:[#allocation8 + $0x41] sm:$0xf] %v83_v7  ;;  %v90_v13 = vld [vmem:[#allocation7 + $0x18] sm:$0xff]  ;;  %v91_v14 = vld [vmem:[#allocation7 + $0x20] sm:$0xff] }
  0x2a   :  { %v67_v5 = vsub.s32 %v64_v4, %v66_v3  ;;  %97 = vst [vmem:[#allocation8 + $0xd] sm:$0xff] %v88_v11  ;;  %98 = vst [vmem:[#allocation8 + $0x15] sm:$0xf] %v89_v12  ;;  %v92_v15 = vld [vmem:[#allocation7 + $0x28] sm:$0xf]  ;;  %v93_v17 = vld [vmem:[#allocation7 + $0x30] sm:$0xff] }
  0x2b   :  { %125 = vst.sshfl [vmem:[#allocation8 + $0x20] sm:$0x1 pattern:$0x73625140] %v61_v8  ;;  %99 = vst [vmem:[#allocation8 + $0x25] sm:$0xff] %v90_v13  ;;  %v94_v18 = vld [vmem:[#allocation7 + $0x38] sm:$0xff] }
  0x2c   :  { %v68_v9 = vrot.slane %v123_v6, %v67_v5  ;;  %100 = vst [vmem:[#allocation8 + $0x2d] sm:$0xff] %v91_v14  ;;  %101 = vst [vmem:[#allocation8 + $0x35] sm:$0xf] %v92_v15  ;;  %v95_v19 = vld [vmem:[#allocation7 + $0x40] sm:$0xf]  ;;  %s193_s2 = scalar_lea.vmem %s111_s28, 1536 }
  0x2d   :  { %102 = vst [vmem:[#allocation8 + $0x45] sm:$0xff] %v93_v17  ;;  %103 = vst [vmem:[#allocation8 + $0x4d] sm:$0xff] %v94_v18  ;;  %p194_p1 = scmp.ne.s32.totalorder %s111_s28, %s193_s2  ;;  %p199_p3 = scmp.lt.s32.totalorder %s193_s2, %s193_s2 }
  0x2e   :  { %v76_v16 = vcombine.high %v68_v9, %v68_v9  ;;  %104 = vst [vmem:[#allocation8 + $0x55] sm:$0xf] %v95_v19 }
  0x2f   :  { %p200_p4 = por %p199_p3, %p198_p2 }
  0x30   :  { %82 = vst [vmem:[#allocation8 + $0x40] sm:$0x1] %v76_v16 }
  0x31   :  { %p201_p5 = pnand %p200_p4, %p194_p1 }
  0x33   :  { %204 = shalt.err (!%p201_p5)
}
  0x34   :  { %116 = dma.vmem_to_hbm [thread:$0]  %s111_s28, 1536, %s267_s3, [#allocation4], %s222_s1, %s222_s1, %s223_s25  }
  0x35   :  { %217 = dma.done.wait [#allocation4], 1536  }
  0x36   :  { %218 = vsyncadd [#allocation4], 4294965760 }
  0x37   :  { %120 = vsyncpa [#allocation3], 1 }
  0x38   :  { %121 = vsyncpa [#allocation6], 1 }
  0x39   :  { %122 = vsyncpa [#allocation4], 1 }

</bundles_post_ra>
